<compile_context>
chip_gen: v5e
topology: v5e:2x2
jax: 0.10.0
libtpu: 0.0.40
codegen_flags: <defaults>
</compile_context>

<pallas_src>
import jax
import jax.numpy as jnp
from jax.experimental import pallas as pl
from jax.experimental.pallas import tpu as pltpu


def policy_kernel(x_ref, w1_ref, b1_ref, w2_ref, b2_ref, out_ref):
    # fc1 + ReLU: bf16 MXU matmul, f32 accumulation, f32 elementwise.
    x = x_ref[...].astype(jnp.bfloat16)                                  # (tb, S)
    h = jnp.dot(x, w1_ref[...], preferred_element_type=jnp.float32) + b1_ref[...]
    h = jnp.maximum(h, 0.0)                                              # (tb, H) f32
    # fc2 with lane-dense padded width (padded logits ~ -1e30 via bias).
    logits = jnp.dot(h.astype(jnp.bfloat16), w2_ref[...],
                     preferred_element_type=jnp.float32) + b2_ref[...]   # (tb, A_pad)
    # Numerically stable softmax over the padded row; padded cols -> exp == 0.
    m = jnp.max(logits, axis=-1, keepdims=True)
    e = jnp.exp(logits - m)
    denom = jnp.sum(e, axis=-1, keepdims=True)
    probs = e / denom                      # exact normalization (EUP/VPU slack)
    a = out_ref.shape[-1]
    # Store only the real A columns -> narrow HBM writeback.
    out_ref[...] = probs[:, :a].astype(out_ref.dtype)


def prepare_params(w1, b1, w2, b2):
    """One-time weight prep (pad fc2 to 128 lanes, cast matmul operands to bf16).

    w1: (S, H), b1: (H,) or (1, H), w2: (H, A), b2: (A,) or (1, A), all f32.
    Weights are stored (in, out) so the kernel computes plain x @ W.
    """
    S, H = w1.shape
    A = w2.shape[-1]
    A_pad = max(128, ((A + 127) // 128) * 128)

    w1_b = w1.astype(jnp.bfloat16)
    b1_p = b1.reshape(1, H).astype(jnp.float32)
    # Zero-pad weight columns; pad bias with a large *finite* negative value so
    # padded logits vanish under softmax (never -inf -> no NaN). b2_p stays f32.
    w2_b = jnp.pad(w2, ((0, 0), (0, A_pad - A))).astype(jnp.bfloat16)
    b2_p = jnp.pad(b2.reshape(1, A), ((0, 0), (0, A_pad - A)),
                   constant_values=-1e30).astype(jnp.float32)
    return {"w1": w1_b, "b1": b1_p, "w2": w2_b, "b2": b2_p, "A": A}


def policy_forward(x, params, *, tb=None):
    """x: (B, S) f32 (or bf16). Returns softmax probabilities (B, A), f32."""
    w1_b, b1_p, w2_b, b2_p, A = (params["w1"], params["b1"], params["w2"],
                                 params["b2"], params["A"])
    B, S = x.shape
    H = w1_b.shape[1]
    A_pad = w2_b.shape[1]

    # Sublane-aligned batch tile.
    B8 = ((B + 7) // 8) * 8
    if tb is None:
        tb = min(1024, B8)
        # v7x megacore: when batch allows it, keep >= 2 grid steps so the
        # "parallel" axis actually shards across both TensorCores.
        if B8 >= 16 and tb >= B8:
            tb = ((B8 // 2 + 7) // 8) * 8
    tb = max(8, (tb // 8) * 8)
    B_pad = ((B + tb - 1) // tb) * tb

    # Pad batch rows with zeros (sliced off at the end).
    x_p = jnp.pad(x, ((0, B_pad - B), (0, 0))) if B_pad != B else x

    grid = (B_pad // tb,)
    out = pl.pallas_call(
        policy_kernel,
        out_shape=jax.ShapeDtypeStruct((B_pad, A), jnp.float32),
        grid_spec=pltpu.PrefetchScalarGridSpec(
            num_scalar_prefetch=0,
            grid=grid,
            in_specs=[
                pl.BlockSpec((tb, S), lambda i: (i, 0)),        # x tile streams
                pl.BlockSpec((S, H), lambda i: (0, 0)),         # weights resident
                pl.BlockSpec((1, H), lambda i: (0, 0)),
                pl.BlockSpec((H, A_pad), lambda i: (0, 0)),
                pl.BlockSpec((1, A_pad), lambda i: (0, 0)),
            ],
            # Narrow output block: last dim == full array dim (A), so the
            # (8,128) divisibility rule does not apply. Masked vst, tiny DMA.
            out_specs=pl.BlockSpec((tb, A), lambda i: (i, 0)),
        ),
        compiler_params=pltpu.CompilerParams(
            dimension_semantics=("parallel",)),
    )(x_p, w1_b, b1_p, w2_b, b2_p)
    return out[:B] if B_pad != B else out


def init_params(key, state_space, action_space, hidden=128):
    k1, k2, k3, k4 = jax.random.split(key, 4)
    # Deterministic, torch-Linear-like uniform init (synthetic weights).
    lim1 = 1.0 / jnp.sqrt(state_space)
    lim2 = 1.0 / jnp.sqrt(hidden)
    w1 = jax.random.uniform(k1, (state_space, hidden), jnp.float32, -lim1, lim1)
    b1 = jax.random.uniform(k2, (hidden,), jnp.float32, -lim1, lim1)
    w2 = jax.random.uniform(k3, (hidden, action_space), jnp.float32, -lim2, lim2)
    b2 = jax.random.uniform(k4, (action_space,), jnp.float32, -lim2, lim2)
    return w1, b1, w2, b2


def _reference(x, w1, b1, w2, b2):
    h = jnp.maximum(x @ w1 + b1.reshape(1, -1), 0.0)
    return jax.nn.softmax(h @ w2 + b2.reshape(1, -1), axis=-1)


if __name__ == "__main__":
    key = jax.random.PRNGKey(0)
    state_space, action_space = 8, 4

    kx, kx2, kp = jax.random.split(key, 3)
    w1, b1, w2, b2 = init_params(kp, state_space, action_space)
    # One-time weight prep (hoisted out of the per-step forward).
    params = jax.block_until_ready(prepare_params(w1, b1, w2, b2))

    # Small batch (single environment step).
    x = jax.random.normal(kx, (2, state_space), jnp.float32)
    out = jax.block_until_ready(policy_forward(x, params))
    ref = _reference(x, w1, b1, w2, b2)
    assert out.shape == (2, action_space)
    assert jnp.allclose(out, ref, atol=2e-2, rtol=2e-2)
    assert jnp.allclose(jnp.sum(out, axis=-1), 1.0, atol=1e-3)

    # Larger, non-aligned batch: exercises row padding and the >=2-step grid.
    x_big = jax.random.normal(kx2, (300, state_space), jnp.float32)
    out_big = jax.block_until_ready(policy_forward(x_big, params))
    ref_big = _reference(x_big, w1, b1, w2, b2)
    assert out_big.shape == (300, action_space)
    assert jnp.allclose(out_big, ref_big, atol=2e-2, rtol=2e-2)
    assert jnp.allclose(jnp.sum(out_big, axis=-1), 1.0, atol=1e-3)

    print("KERNEL_OK")
</pallas_src>

<mosaic_0001>
module attributes {stable_mosaic.version = 11 : i64} {
  func.func @policy_kernel(%arg0: i32, %arg1: memref<8x8xf32, #tpu.memory_space<vmem>>, %arg2: memref<8x128xbf16, #tpu.memory_space<vmem>>, %arg3: memref<1x128xf32, #tpu.memory_space<vmem>>, %arg4: memref<128x128xbf16, #tpu.memory_space<vmem>>, %arg5: memref<1x128xf32, #tpu.memory_space<vmem>>, %arg6: memref<8x4xf32, #tpu.memory_space<vmem>>) attributes {dimension_semantics = [#tpu.dimension_semantics<parallel>], iteration_bounds = array<i64: 1>, scalar_prefetch = 0 : i64, scratch_operands = 0 : i64, tpu.core_type = #tpu.core_type<tc>, window_params = [{transform_indices = @transform_0, window_bounds = array<i64: 8, 8>}, {pipeline_mode = #tpu.pipeline_mode<synchronous>, transform_indices = @transform_1, window_bounds = array<i64: 8, 128>}, {pipeline_mode = #tpu.pipeline_mode<synchronous>, transform_indices = @transform_2, window_bounds = array<i64: 1, 128>}, {pipeline_mode = #tpu.pipeline_mode<synchronous>, transform_indices = @transform_3, window_bounds = array<i64: 128, 128>}, {pipeline_mode = #tpu.pipeline_mode<synchronous>, transform_indices = @transform_4, window_bounds = array<i64: 1, 128>}, {transform_indices = @transform_5, window_bounds = array<i64: 8, 4>}]} {
    %c0 = arith.constant 0 : index
    %c0_0 = arith.constant 0 : index
    %0 = vector.load %arg1[%c0, %c0_0] : memref<8x8xf32, #tpu.memory_space<vmem>>, vector<8x8xf32>
    %1 = arith.truncf %0 : vector<8x8xf32> to vector<8x8xbf16>
    %c0_1 = arith.constant 0 : index
    %c0_2 = arith.constant 0 : index
    %2 = vector.load %arg2[%c0_1, %c0_2] : memref<8x128xbf16, #tpu.memory_space<vmem>>, vector<8x128xbf16>
    %cst = arith.constant dense<0.000000e+00> : vector<8x128xf32>
    %3 = tpu.matmul %1, %2, %cst {dimension_numbers = #tpu.dot_dimension_numbers<[1], [0], [0], [1], [0, 0, 1, 1], [], []>} : vector<8x8xbf16>, vector<8x128xbf16>, vector<8x128xf32> -> vector<8x128xf32>
    %c0_3 = arith.constant 0 : index
    %c0_4 = arith.constant 0 : index
    %4 = vector.load %arg3[%c0_3, %c0_4] : memref<1x128xf32, #tpu.memory_space<vmem>>, vector<1x128xf32>
    %5 = vector.broadcast %4 : vector<1x128xf32> to vector<8x128xf32>
    %6 = arith.addf %3, %5 : vector<8x128xf32>
    %cst_5 = arith.constant 0.000000e+00 : f32
    %7 = vector.broadcast %cst_5 : f32 to vector<8x128xf32>
    %8 = arith.maximumf %6, %7 : vector<8x128xf32>
    %9 = arith.truncf %8 : vector<8x128xf32> to vector<8x128xbf16>
    %c0_6 = arith.constant 0 : index
    %c0_7 = arith.constant 0 : index
    %10 = vector.load %arg4[%c0_6, %c0_7] : memref<128x128xbf16, #tpu.memory_space<vmem>>, vector<128x128xbf16>
    %cst_8 = arith.constant dense<0.000000e+00> : vector<8x128xf32>
    %11 = tpu.matmul %9, %10, %cst_8 {dimension_numbers = #tpu.dot_dimension_numbers<[1], [0], [0], [1], [0, 0, 1, 1], [], []>} : vector<8x128xbf16>, vector<128x128xbf16>, vector<8x128xf32> -> vector<8x128xf32>
    %c0_9 = arith.constant 0 : index
    %c0_10 = arith.constant 0 : index
    %12 = vector.load %arg5[%c0_9, %c0_10] : memref<1x128xf32, #tpu.memory_space<vmem>>, vector<1x128xf32>
    %13 = vector.broadcast %12 : vector<1x128xf32> to vector<8x128xf32>
    %14 = arith.addf %11, %13 : vector<8x128xf32>
    %cst_11 = arith.constant dense<0xFF800000> : vector<8xf32>
    %15 = vector.multi_reduction <maximumf>, %14, %cst_11 [1] : vector<8x128xf32> to vector<8xf32>
    %16 = vector.shape_cast %15 : vector<8xf32> to vector<8x1xf32>
    %17 = vector.broadcast %16 : vector<8x1xf32> to vector<8x128xf32>
    %18 = arith.subf %14, %17 : vector<8x128xf32>
    %19 = math.exp %18 : vector<8x128xf32>
    %cst_12 = arith.constant dense<0.000000e+00> : vector<8xf32>
    %20 = vector.multi_reduction <add>, %19, %cst_12 [1] : vector<8x128xf32> to vector<8xf32>
    %21 = vector.shape_cast %20 : vector<8xf32> to vector<8x1xf32>
    %22 = vector.broadcast %21 : vector<8x1xf32> to vector<8x128xf32>
    %23 = arith.divf %19, %22 : vector<8x128xf32>
    %24 = vector.extract_strided_slice %23 {offsets = [0, 0], sizes = [8, 4], strides = [1, 1]} : vector<8x128xf32> to vector<8x4xf32>
    %c0_13 = arith.constant 0 : index
    %c0_14 = arith.constant 0 : index
    %25 = vector.load %arg6[%c0_13, %c0_14] : memref<8x4xf32, #tpu.memory_space<vmem>>, vector<8x4xf32>
    tpu.vector_store %arg6[%c0_13, %c0_14], %24 {strides = array<i32>} : memref<8x4xf32, #tpu.memory_space<vmem>>, vector<8x4xf32>,
    return
  }
  func.func @transform_0(%arg0: i32) -> (i32, i32) {
    %c0_i32 = arith.constant 0 : i32
    %c0_i32_0 = arith.constant 0 : i32
    return %arg0, %c0_i32 : i32, i32
  }
  func.func @transform_1(%arg0: i32) -> (i32, i32) {
    %c0_i32 = arith.constant 0 : i32
    %c0_i32_0 = arith.constant 0 : i32
    %c0_i32_1 = arith.constant 0 : i32
    return %c0_i32, %c0_i32_0 : i32, i32
  }
  func.func @transform_2(%arg0: i32) -> (i32, i32) {
    %c0_i32 = arith.constant 0 : i32
    %c0_i32_0 = arith.constant 0 : i32
    %c0_i32_1 = arith.constant 0 : i32
    return %c0_i32, %c0_i32_0 : i32, i32
  }
  func.func @transform_3(%arg0: i32) -> (i32, i32) {
    %c0_i32 = arith.constant 0 : i32
    %c0_i32_0 = arith.constant 0 : i32
    %c0_i32_1 = arith.constant 0 : i32
    return %c0_i32, %c0_i32_0 : i32, i32
  }
  func.func @transform_4(%arg0: i32) -> (i32, i32) {
    %c0_i32 = arith.constant 0 : i32
    %c0_i32_0 = arith.constant 0 : i32
    %c0_i32_1 = arith.constant 0 : i32
    return %c0_i32, %c0_i32_0 : i32, i32
  }
  func.func @transform_5(%arg0: i32) -> (i32, i32) {
    %c0_i32 = arith.constant 0 : i32
    %c0_i32_0 = arith.constant 0 : i32
    return %arg0, %c0_i32 : i32, i32
  }
}

</mosaic_0001>

<bundles_post_ra>
// kernel: tpu_custom_call.1
= control target key start
LH: loop header
LB: loop body
LE: loop exit
PB: predicated region body
PF: predicated region fallthrough
CT: control target
= control target key end

     0   :  { %10 = vsyncpa [#allocation3], 0  ;;  %s386_s0 = inlined_call_operand.hbm [shape: f32[8,8], index: 0, kind: input, shape index: {}]   ;;  %s387_s1 = inlined_call_operand.hbm [shape: bf16[8,128], index: 1, kind: input, shape index: {}]   ;;  %s388_s2 = inlined_call_operand.vmem [shape: f32[1,128], index: 2, kind: input, shape index: {}]   ;;  %s389_s3 = inlined_call_operand.hbm [shape: bf16[128,128], index: 3, kind: input, shape index: {}]   ;;  %s390_s4 = inlined_call_operand.vmem [shape: f32[1,128], index: 4, kind: input, shape index: {}]   ;;  %s391_s5 = inlined_call_operand.vmem [shape: f32[8,4], index: 5, kind: output, shape index: {}]  }
   0x1   :  { %11 = vsyncpa [#allocation5], 0  ;;  %s28_s20 = sshll.u32 %s387_s1, 4  ;;  %s333_s21 = smov [#allocation4]   ;;  %s29_s20 = int_to_ptr.hbm [resolvable:$true] %s28_s20 }
   0x2   :  { %s30_s22 = sshll.u32 %s333_s21, 4  ;;  %s17_s25 = sshll.u32 %s386_s0, 4  ;;  %s31_s22 = int_to_ptr.vmem [resolvable:$true] %s30_s22  ;;  %s18_s25 = int_to_ptr.hbm [resolvable:$true] %s17_s25 }
   0x3   :  { %33 = dma.hbm_to_vmem [thread:$0]  %s29_s20, 64, %s31_s22, [#allocation5]  }
   0x4   :  { %s334_s26 = smov [#allocation2]   ;;  %s40_s30 = sshll.u32 %s389_s3, 4  ;;  %s41_s30 = int_to_ptr.hbm [resolvable:$true] %s40_s30 }
   0x5   :  { %s19_s27 = sshll.u32 %s334_s26, 4  ;;  %s335_s1 = smov [#allocation6]   ;;  %s20_s27 = int_to_ptr.vmem [resolvable:$true] %s19_s27 }
   0x6   :  { %22 = dma.hbm_to_vmem [thread:$0]  %s18_s25, 128, %s20_s27, [#allocation3]  }
   0x7   :  { %s42_s6 = sshll.u32 %s335_s1, 4  ;;  %s336_s7 = smov 64   ;;  %s43_s6 = int_to_ptr.vmem [resolvable:$true] %s42_s6 }
   0x8   :  { %s337_s8 = smov 4  }
   0x9   :  { %48 = dma.hbm_to_vmem [thread:$0]  %s41_s30, 1024, %s43_s6, [#allocation5], %s336_s7, %s336_s7, %s337_s8  }
   0xa   :  { %329 = dma.done.wait [#allocation3], 128  }
   0xb   :  { %330 = vsyncadd [#allocation3], 4294967168 }
   0xc   :  { %331 = dma.done.wait [#allocation5], 1088  }
   0xd   :  { %332 = vsyncadd [#allocation5], 4294966208  ;;  %vm75_vm0 = vcmask 1043456   ;;  %v66_v0 = vld [vmem:[#allocation4] sm:$0xf]  ;;  %v64_v1 = vld [vmem:[#allocation2] sm:$0xff] }
   0xe   :  { %v245_v2 = vld [vmem:[#allocation6 + $0x38] sm:$0xff]  ;;  %v77_v3 = vsel %vm75_vm0, %v66_v0, 0  ;;  %v65_v4 = vpack.c.bf16 %v64_v1, %v64_v1  ;;  %vm71_vm1 = vcmask 64512   ;;  %v244_v5 = vld [vmem:[#allocation6 + $0x30] sm:$0xff]  ;;  %v243_v6 = vld [vmem:[#allocation6 + $0x28] sm:$0xff]  ;;  %vm197_vm6 = vcmask 31744  }
   0xf   :  { %86 = vmatpush.bf16.msra.mxu0 %v77_v3  ;;  %162 = vmatpush.bf16.msra.mxu1 %v245_v2  ;;  %v242_v7 = vld [vmem:[#allocation6 + $0x20] sm:$0xff]  ;;  %v241_v8 = vld [vmem:[#allocation6 + $0x18] sm:$0xff]  ;;  %v240_v9 = vld [vmem:[#allocation6 + $0x10] sm:$0xff] }
  0x10   :  { %v239_v10 = vld [vmem:[#allocation6 + $0x8] sm:$0xff]  ;;  %v238_v11 = vld [vmem:[#allocation6] sm:$0xff]  ;;  %v251_v12 = vld [vmem:[%s388_s2] ss:$0 sm:$0xff] }
  0x11   :  { %v252_v18 = vld [vmem:[%s390_s4] ss:$0 sm:$0xff] }
  0x12   :  { %205 = vmatmul.msk.bf16.vlgmr.msra.gmra.mxu0 %vm71_vm1, %v65_v4 }
  0x13   :  { %163 = vmatpush.bf16.msra.mxu1 %v244_v5 }
  0x17   :  { %164 = vmatpush.bf16.msra.mxu1 %v243_v6 }
  0x1b   :  { %165 = vmatpush.bf16.msra.mxu1 %v242_v7 }
  0x1f   :  { %166 = vmatpush.bf16.msra.mxu1 %v241_v8 }
  0x23   :  { %167 = vmatpush.bf16.msra.mxu1 %v240_v9 }
  0x27   :  { %168 = vmatpush.bf16.msra.mxu1 %v239_v10 }
  0x2b   :  { %169 = vmatpush.bf16.msra.mxu1 %v238_v11 }
  0x8f   :  { %v88_v13 = vpop.f32.mrf.mxu0 }
  0x90   :  { %v89_v14 = vadd.f32 %v251_v12, %v88_v13 }
  0x92   :  { %v92_v15 = vmax.f32 %v89_v14, 0.0 }
  0x94   :  { %v93_v16 = vpack.c.bf16 %v92_v15, %v92_v15 }
  0x96   :  { %170 = vmatmul.bf16.vlgmr.msra.gmra.mxu1 %v93_v16 }
  0x97   :  { %v90_v17 = vpop.f32.mrf.mxu0 }
 0x113   :  { %v171_v19 = vpop.f32.mrf.mxu1 }
 0x114   :  { %v172_v20 = vadd.f32 %v252_v18, %v171_v19 }
 0x116   :  { %175 = vmax.xlane.f32.xlu0 %v172_v20 }
 0x11b   :  { %v173_v21 = vpop.f32.mrf.mxu1 }
 0x189   :  { %v176_v22 = vpop.xlane.xlu0 %175 }
 0x18a   :  { %v177_v23 = vsub.f32 %v172_v20, %v176_v22 }
 0x18c   :  { %v178_v24 = vmul.f32 1.442695, %v177_v23 }
 0x18e   :  { %253 = vpow2.f32 %v178_v24 }
 0x194   :  { %v254_v25 = vpop.eup %253 }
 0x195   :  { %180 = vadd.xlane.f32.xlu0 %v254_v25 }
 0x208   :  { %v181_v26 = vpop.xlane.xlu0 %180 }
 0x209   :  { %255 = vrcp.f32 %v181_v26  ;;  %v193_v30 = vand.u32 2147483648, %v181_v26  ;;  %v191_v32 = vand.u32 2147483647, %v181_v26  ;;  %vm187_vm3 = vweird.f32 %v181_v26 }
 0x20b   :  { %v194_v34 = vor.u32 1.1754944e-38, %v193_v30  ;;  %vm192_vm5 = vcmp.eq.f32.partialorder %v191_v32, 8.507059e+37 }
 0x20f   :  { %v256_v27 = vpop.eup %255 }
 0x210   :  { %v183_v28 = vmul.f32 %v256_v27, %v181_v26  ;;  %vm188_vm2 = vweird.f32 %v256_v27 }
 0x211   :  { %vm189_vm4 = vmor %vm187_vm3, %vm188_vm2 }
 0x212   :  { %v184_v29 = vsub.f32 1.0, %v183_v28 }
 0x214   :  { %v185_v31 = vmul.f32 %v256_v27, %v184_v29 }
 0x216   :  { %v186_v33 = vadd.f32 %v256_v27, %v185_v31 }
 0x218   :  { %v190_v35 = vsel %vm189_vm4, %v256_v27, %v186_v33 }
 0x219   :  { %v195_v36 = vsel %vm192_vm5, %v194_v34, %v190_v35 }
 0x21a   :  { %v196_v37 = vmul.f32 %v254_v25, %v195_v36 }
 0x21c   :  { %198 = vst.msk [vmem:[%s391_s5] sm:$0xff] %vm197_vm6, %v196_v37 }
 0x21d   :  { %203 = vsyncpa [#allocation3], 1 }
 0x21e   :  { %204 = vsyncpa [#allocation5], 1 }

</bundles_post_ra>
